<compile_context>
chip_gen: v7x
topology: tpu7x:2x2x1
jax: 0.10.0
libtpu: 0.0.40
codegen_flags: <defaults>
</compile_context>

<pallas_src>
import jax
import jax.numpy as jnp
from jax.experimental import pallas as pl
from jax.experimental.pallas import tpu as pltpu


def _ic_loss_rows_kernel(feat_ref, lab_ref, qfeat_ref, qlab_ref, mlpp_ref):
    """Per-row mean_log_prob_pos for one [tm, D] tile of anchor features.

    feat_ref : [tm, D] f32  anchor features (row tile)
    lab_ref  : [tm, 1] i32  anchor labels (row tile)
    qfeat_ref: [D, Q]  f32  queue features, pre-transposed and pre-scaled by 1/tau
                            (constant index_map -> VMEM-resident across the grid)
    qlab_ref : [1, Q]  i32  queue labels (VMEM-resident)
    mlpp_ref : [tm, 1] f32  per-row mean_log_prob_pos (NaN when sum(mask)==0,
                            exactly like the torch code)
    """
    feats = feat_ref[...]          # [tm, D]
    labels = lab_ref[...]          # [tm, 1]
    qfeats_t = qfeat_ref[...]      # [D, Q]
    qlabels = qlab_ref[...]        # [1, Q]

    # label-equality mask, [tm, Q]
    mask = (labels == qlabels).astype(jnp.float32)

    # anchor_dot_contrast / tau (1/tau already folded into the cached queue copy).
    # Precision.HIGHEST keeps the matmul f32-accurate so the value-equality
    # `logits == 0` mask below matches the f32 reference.
    # TODO(synk): bf16 MXU feed (cast feats/queue, keep f32 accumulation) cuts MXU
    # passes ~3x at production D/Q but can shift logits==0 tie positions; not applied.
    adc = jnp.dot(feats, qfeats_t,
                  precision=jax.lax.Precision.HIGHEST,
                  preferred_element_type=jnp.float32)            # [tm, Q]

    # numerically-stable logits (row max subtracted; .detach() is a no-op in forward)
    logits_max = jnp.max(adc, axis=1, keepdims=True)             # [tm, 1]
    logits = adc - logits_max                                    # [tm, Q]

    # torch: logits_mask = ones_like(logits); logits_mask[logits == 0] = 0
    logits_mask = jnp.where(logits == 0.0,
                            jnp.float32(0.0), jnp.float32(1.0))  # [tm, Q]
    mask = mask * logits_mask

    # masked log-sum-exp, kept 2-D throughout
    exp_logits = jnp.exp(logits) * logits_mask                   # [tm, Q]
    lse = jnp.log(jnp.sum(exp_logits, axis=1, keepdims=True))    # [tm, 1]

    # mean_log_prob_pos = sum(mask*(logits - lse))/sum(mask)
    #                   = sum(mask*logits)/sum(mask) - lse   (no [tm,Q] log_prob temp;
    #                     rows with sum(mask)==0 give NaN, exactly as in torch)
    sum_mask = jnp.sum(mask, axis=1, keepdims=True)                  # [tm, 1]
    sum_mask_logits = jnp.sum(mask * logits, axis=1, keepdims=True)  # [tm, 1]
    mlpp_ref[...] = sum_mask_logits / sum_mask - lse                 # [tm, 1]


def _round_up(x, m):
    return (x + m - 1) // m * m


def ic_loss_pallas(features, labels, queue_features_t_scaled, queue_labels_row,
                   *, block_rows=512):
    """Batched Pallas ICLoss.forward.

    features               : [N, D] float32 -- all images' RoI features batched.
    labels                 : [N] (or [N,1]) int32
    queue_features_t_scaled: [D, Q] float32 -- queue features PRE-transposed with
                             1/tau folded in; cache this when the queue is updated.
    queue_labels_row       : [Q] or [1, Q] int32 -- cache pre-reshaped to [1, Q].
    block_rows             : row tile size (multiple of 8; >=256 recommended on
                             v6e/v7x, >=128 on v5e for real N).

    Returns the scalar float32 loss (NaN -> 0.0 fallback, matching torch).
    """
    N, D = features.shape
    D2, Q = queue_features_t_scaled.shape
    assert D == D2
    qlabels_row = queue_labels_row.reshape(1, Q).astype(jnp.int32)
    labels_col = labels.reshape(N, 1).astype(jnp.int32)

    # Row tiling: tm multiple of 8; pad N up to a multiple of tm.  Padded rows are
    # sliced away BEFORE the mean so their 0/0 NaN cannot zero the whole loss.
    tm = min(block_rows, _round_up(N, 8))
    n_pad = _round_up(N, tm)
    num_blocks = n_pad // tm
    if n_pad != N:
        features = jnp.pad(features, ((0, n_pad - N), (0, 0)))
        labels_col = jnp.pad(labels_col, ((0, n_pad - N), (0, 0)),
                             constant_values=-1)

    cost = pl.CostEstimate(
        flops=2 * n_pad * D * Q,
        transcendentals=n_pad * Q + n_pad,
        bytes_accessed=4 * (n_pad * D + n_pad + D * Q + Q + n_pad),
    )

    mlpp = pl.pallas_call(
        _ic_loss_rows_kernel,
        out_shape=jax.ShapeDtypeStruct((n_pad, 1), jnp.float32),
        grid=(num_blocks,),
        in_specs=[
            pl.BlockSpec((tm, D), lambda i: (i, 0)),   # features: row tile
            pl.BlockSpec((tm, 1), lambda i: (i, 0)),   # labels:   row tile
            pl.BlockSpec((D, Q), lambda i: (0, 0)),    # queue feats: VMEM-resident
            pl.BlockSpec((1, Q), lambda i: (0, 0)),    # queue labels: VMEM-resident
        ],
        out_specs=pl.BlockSpec((tm, 1), lambda i: (i, 0)),  # per-block partials
        compiler_params=pltpu.CompilerParams(
            dimension_semantics=("parallel",)),        # shards across v7x's 2 TCs
        cost_estimate=cost,
    )(features, labels_col, queue_features_t_scaled, qlabels_row)

    # Trivial final reduction in XLA over REAL rows only; NaN -> 0.0 matches torch
    # (a real row with no positives still zeroes the whole loss, as written).
    loss = -jnp.mean(mlpp[:N, 0])
    return jnp.where(jnp.isnan(loss), jnp.float32(0.0), loss)


def ic_loss_ref(features, labels, queue_features, queue_labels, *, tau):
    """Plain-JAX reference replicating the torch forward (f32-accurate matmul)."""
    mask = (labels[:, None] == queue_labels[None, :]).astype(jnp.float32)
    adc = jnp.matmul(features, queue_features.T,
                     precision=jax.lax.Precision.HIGHEST) / tau
    logits_max = jnp.max(adc, axis=1, keepdims=True)
    logits = adc - logits_max
    logits_mask = jnp.where(logits == 0.0, 0.0, 1.0)
    mask = mask * logits_mask
    exp_logits = jnp.exp(logits) * logits_mask
    log_prob = logits - jnp.log(jnp.sum(exp_logits, axis=1, keepdims=True))
    mean_log_prob_pos = jnp.sum(mask * log_prob, axis=1) / jnp.sum(mask, axis=1)
    loss = -jnp.mean(mean_log_prob_pos)
    return jnp.where(jnp.isnan(loss), jnp.float32(0.0), loss)


if __name__ == "__main__":
    # Module hyperparameters (deterministic, in-script; no checkpoint load).
    ic_loss_out_dim = 32          # D
    ic_loss_queue_size = 128      # Q
    ic_loss_queue_tau = 0.1
    # ic_loss_weight is stored by the module but not applied inside forward().

    # Small batched example: 5 images x 16 RoIs, all fed to ONE kernel call.
    n_images, rois_per_image = 5, 16
    N = n_images * rois_per_image           # 80 (not a tile multiple -> exercises padding)
    D, Q = ic_loss_out_dim, ic_loss_queue_size

    key = jax.random.PRNGKey(0)
    k_f, k_l, k_qf, k_ql = jax.random.split(key, 4)

    features = jax.random.normal(k_f, (N, D), dtype=jnp.float32)
    features = features / jnp.linalg.norm(features, axis=1, keepdims=True)
    labels = jax.random.randint(k_l, (N,), 0, 4, dtype=jnp.int32)

    queue_features = jax.random.normal(k_qf, (Q, D), dtype=jnp.float32)
    queue_features = queue_features / jnp.linalg.norm(
        queue_features, axis=1, keepdims=True)
    queue_labels = jax.random.randint(k_ql, (Q,), 0, 4, dtype=jnp.int32)

    # Persistent queue state: cache the [D, Q] layout with 1/tau folded in and the
    # [1, Q] labels once per queue update (not per loss call).
    queue_features_t_scaled = (queue_features.T / ic_loss_queue_tau).astype(jnp.float32)
    queue_labels_row = queue_labels.reshape(1, Q)

    # block_rows=32 to exercise the multi-block grid + padding at this toy N;
    # use >=256 for production N on v6e/v7x.
    loss = ic_loss_pallas(features, labels, queue_features_t_scaled,
                          queue_labels_row, block_rows=32)
    loss = jax.block_until_ready(loss)

    loss_ref = ic_loss_ref(features, labels, queue_features, queue_labels,
                           tau=ic_loss_queue_tau)
    assert jnp.allclose(loss, loss_ref, rtol=1e-3, atol=1e-3), (loss, loss_ref)

    print("KERNEL_OK")
</pallas_src>

<mosaic_0001>
module attributes {stable_mosaic.version = 11 : i64} {
  func.func @_ic_loss_rows_kernel(%arg0: i32, %arg1: memref<32x32xf32, #tpu.memory_space<vmem>>, %arg2: memref<32x1xi32, #tpu.memory_space<vmem>>, %arg3: memref<32x128xf32, #tpu.memory_space<vmem>>, %arg4: memref<1x128xi32, #tpu.memory_space<vmem>>, %arg5: memref<32x1xf32, #tpu.memory_space<vmem>>) attributes {dimension_semantics = [#tpu.dimension_semantics<parallel>], iteration_bounds = array<i64: 3>, scalar_prefetch = 0 : i64, scratch_operands = 0 : i64, tpu.core_type = #tpu.core_type<tc>, window_params = [{transform_indices = @transform_0, window_bounds = array<i64: 32, 32>}, {transform_indices = @transform_1, window_bounds = array<i64: 32, 1>}, {pipeline_mode = #tpu.pipeline_mode<synchronous>, transform_indices = @transform_2, window_bounds = array<i64: 32, 128>}, {pipeline_mode = #tpu.pipeline_mode<synchronous>, transform_indices = @transform_3, window_bounds = array<i64: 1, 128>}, {transform_indices = @transform_4, window_bounds = array<i64: 32, 1>}]} {
    %c0 = arith.constant 0 : index
    %c0_0 = arith.constant 0 : index
    %0 = vector.load %arg1[%c0, %c0_0] : memref<32x32xf32, #tpu.memory_space<vmem>>, vector<32x32xf32>
    %c0_1 = arith.constant 0 : index
    %c0_2 = arith.constant 0 : index
    %1 = vector.load %arg2[%c0_1, %c0_2] : memref<32x1xi32, #tpu.memory_space<vmem>>, vector<32x1xi32>
    %c0_3 = arith.constant 0 : index
    %c0_4 = arith.constant 0 : index
    %2 = vector.load %arg3[%c0_3, %c0_4] : memref<32x128xf32, #tpu.memory_space<vmem>>, vector<32x128xf32>
    %c0_5 = arith.constant 0 : index
    %c0_6 = arith.constant 0 : index
    %3 = vector.load %arg4[%c0_5, %c0_6] : memref<1x128xi32, #tpu.memory_space<vmem>>, vector<1x128xi32>
    %4 = vector.broadcast %1 : vector<32x1xi32> to vector<32x128xi32>
    %5 = vector.broadcast %3 : vector<1x128xi32> to vector<32x128xi32>
    %6 = arith.cmpi eq, %4, %5 : vector<32x128xi32>
    %7 = arith.extui %6 : vector<32x128xi1> to vector<32x128xi32>
    %8 = arith.sitofp %7 : vector<32x128xi32> to vector<32x128xf32>
    %cst = arith.constant dense<0.000000e+00> : vector<32x128xf32>
    %9 = tpu.matmul %0, %2, %cst {dimension_numbers = #tpu.dot_dimension_numbers<[1], [0], [0], [1], [0, 0, 1, 1], [], []>, precision = #tpu.contract_precision<fp32>} : vector<32x32xf32>, vector<32x128xf32>, vector<32x128xf32> -> vector<32x128xf32>
    %cst_7 = arith.constant dense<0xFF800000> : vector<32xf32>
    %10 = vector.multi_reduction <maximumf>, %9, %cst_7 [1] : vector<32x128xf32> to vector<32xf32>
    %11 = vector.shape_cast %10 : vector<32xf32> to vector<32x1xf32>
    %12 = vector.broadcast %11 : vector<32x1xf32> to vector<32x128xf32>
    %13 = arith.subf %9, %12 : vector<32x128xf32>
    %cst_8 = arith.constant 0.000000e+00 : f32
    %14 = vector.broadcast %cst_8 : f32 to vector<32x128xf32>
    %15 = arith.cmpf oeq, %13, %14 : vector<32x128xf32>
    %cst_9 = arith.constant 0.000000e+00 : f32
    %cst_10 = arith.constant 1.000000e+00 : f32
    %16 = vector.broadcast %cst_9 : f32 to vector<32x128xf32>
    %17 = vector.broadcast %cst_10 : f32 to vector<32x128xf32>
    %18 = arith.select %15, %16, %17 : vector<32x128xi1>, vector<32x128xf32>
    %19 = arith.mulf %8, %18 : vector<32x128xf32>
    %20 = math.exp %13 : vector<32x128xf32>
    %21 = arith.mulf %20, %18 : vector<32x128xf32>
    %cst_11 = arith.constant dense<0.000000e+00> : vector<32xf32>
    %22 = vector.multi_reduction <add>, %21, %cst_11 [1] : vector<32x128xf32> to vector<32xf32>
    %23 = vector.shape_cast %22 : vector<32xf32> to vector<32x1xf32>
    %24 = math.log %23 : vector<32x1xf32>
    %cst_12 = arith.constant dense<0.000000e+00> : vector<32xf32>
    %25 = vector.multi_reduction <add>, %19, %cst_12 [1] : vector<32x128xf32> to vector<32xf32>
    %26 = vector.shape_cast %25 : vector<32xf32> to vector<32x1xf32>
    %27 = arith.mulf %19, %13 : vector<32x128xf32>
    %cst_13 = arith.constant dense<0.000000e+00> : vector<32xf32>
    %28 = vector.multi_reduction <add>, %27, %cst_13 [1] : vector<32x128xf32> to vector<32xf32>
    %29 = vector.shape_cast %28 : vector<32xf32> to vector<32x1xf32>
    %30 = arith.divf %29, %26 : vector<32x1xf32>
    %31 = arith.subf %30, %24 : vector<32x1xf32>
    %c0_14 = arith.constant 0 : index
    %c0_15 = arith.constant 0 : index
    %32 = vector.load %arg5[%c0_14, %c0_15] : memref<32x1xf32, #tpu.memory_space<vmem>>, vector<32x1xf32>
    tpu.vector_store %arg5[%c0_14, %c0_15], %31 {strides = array<i32>} : memref<32x1xf32, #tpu.memory_space<vmem>>, vector<32x1xf32>,
    return
  }
  func.func @transform_0(%arg0: i32) -> (i32, i32) {
    %c0_i32 = arith.constant 0 : i32
    %c0_i32_0 = arith.constant 0 : i32
    return %arg0, %c0_i32 : i32, i32
  }
  func.func @transform_1(%arg0: i32) -> (i32, i32) {
    %c0_i32 = arith.constant 0 : i32
    %c0_i32_0 = arith.constant 0 : i32
    return %arg0, %c0_i32 : i32, i32
  }
  func.func @transform_2(%arg0: i32) -> (i32, i32) {
    %c0_i32 = arith.constant 0 : i32
    %c0_i32_0 = arith.constant 0 : i32
    %c0_i32_1 = arith.constant 0 : i32
    return %c0_i32, %c0_i32_0 : i32, i32
  }
  func.func @transform_3(%arg0: i32) -> (i32, i32) {
    %c0_i32 = arith.constant 0 : i32
    %c0_i32_0 = arith.constant 0 : i32
    %c0_i32_1 = arith.constant 0 : i32
    return %c0_i32, %c0_i32_0 : i32, i32
  }
  func.func @transform_4(%arg0: i32) -> (i32, i32) {
    %c0_i32 = arith.constant 0 : i32
    %c0_i32_0 = arith.constant 0 : i32
    return %arg0, %c0_i32 : i32, i32
  }
}

</mosaic_0001>

<bundles_post_ra>
// kernel: tpu_custom_call.1
= control target key start
LH: loop header
LB: loop body
LE: loop exit
PB: predicated region body
PF: predicated region fallthrough
CT: control target
= control target key end

     0   :  { %s1339_s15 = smov 0   ;;  %s1447_s0 = inlined_call_operand.vmem [shape: f32[96,32], index: 0, kind: input, shape index: {}]   ;;  %s1448_s1 = inlined_call_operand.vmem [shape: s32[96,1], index: 1, kind: input, shape index: {}]   ;;  %s1449_s2 = inlined_call_operand.vmem [shape: f32[32,128], index: 2, kind: input, shape index: {}]   ;;  %s1450_s3 = inlined_call_operand.vmem [shape: s32[1,128], index: 3, kind: input, shape index: {}]   ;;  %s1451_s4 = inlined_call_operand.vmem [shape: f32[96,1], index: 4, kind: output, shape index: {}]  }
   0x1 LB: > { %s1048_s16 = sadd.s32 4294967295, %s1309_s15   ;;  %p1052_p0 = scmp.ge.s32.totalorder %s1309_s15, 1  ;;  %s1309_s15 = sphi %s1339_s15, %s14_s15  }
   0x2   : > { %p174_p1 = scmp.lt.s32.totalorder %s1309_s15, 4 }
   0x4   : > { %p175_p2 = pnand %p1052_p0, %p174_p1 }
   0x5   : > { %v231_v0 = vld [vmem:[%s1449_s2] sm:$0xff] (!%p175_p2)  ;;  %v232_v1 = vld [vmem:[%s1449_s2 + $0x8] sm:$0xff] (!%p175_p2)  ;;  %v233_v2 = vld [vmem:[%s1449_s2 + $0x10] sm:$0xff] (!%p175_p2)  ;;  %s1053_s23 = sshll.u32 (!%p175_p2), %s1048_s16, 2  ;;  %v1311_v7 = vmov (!%p175_p2), 0   ;;  %vm264_vm0 = vcmask (!%p175_p2), 261120  }
   0x6   : > { %178 = sbr.rel (%p175_p2) target bundleno = 592 (0x250), region = 36  ;;  %v278_v3 = vand.u32 (!%p175_p2), 4294901760, %v231_v0  ;;  %v281_v4 = vand.u32 (!%p175_p2), 4294901760, %v232_v1  ;;  %v234_v5 = vld [vmem:[%s1449_s2 + $0x18] sm:$0xff] (!%p175_p2)  ;;  %v284_v6 = vand.u32 (!%p175_p2), 4294901760, %v233_v2  ;;  %p206_p3 = scmp.lt.s32.totalorder (!%p175_p2), %s1053_s23, 11  ;;  %1278 = vset.pattern.permute.xlu1 (!%p175_p2), %v1311_v7  ;;  %1277 = vset.pattern.permute.xlu0 (!%p175_p2), %v1311_v7 }
   0x7   : > { %v287_v8 = vand.u32 (!%p175_p2), 4294901760, %v234_v5  ;;  %vm975_vm9 = vcmask (!%p175_p2), 7168  }
   0x8   : > { %v1359_v9 = vpack.c.bf16 (!%p175_p2), %v281_v4, %v278_v3  ;;  %v1361_v10 = vsub.f32 (!%p175_p2), %v231_v0, %v278_v3  ;;  %v1363_v11 = vsub.f32 (!%p175_p2), %v232_v1, %v281_v4  ;;  %v1365_v12 = vsub.f32 (!%p175_p2), %v233_v2, %v284_v6 }
   0x9   : > { %v1367_v13 = vpack.c.bf16 (!%p175_p2), %v287_v8, %v284_v6  ;;  %v1369_v14 = vsub.f32 (!%p175_p2), %v234_v5, %v287_v8 }
   0xa   : > { %1223 = vmatprep.subr.bf16.mxu0 (!%p175_p2), %v1359_v9  ;;  %1199 = vmatprep.subr.bf16.mxu1 (!%p175_p2), %v1359_v9  ;;  %v389_v15 = vand.u32 (!%p175_p2), 4294901760, %v1361_v10  ;;  %v396_v16 = vand.u32 (!%p175_p2), 4294901760, %v1363_v11  ;;  %v403_v17 = vand.u32 (!%p175_p2), 4294901760, %v1365_v12  ;;  %v1214_v61 = vpack.c.bf16 (!%p175_p2), %v1363_v11, %v1361_v10 }
   0xb   : > { %1225 = vmatpush3.bf16.msra.mxu0 (!%p175_p2), %v1359_v9  ;;  %1201 = vmatpush3.bf16.msra.mxu1 (!%p175_p2), %v1359_v9  ;;  %v410_v18 = vand.u32 (!%p175_p2), 4294901760, %v1369_v14  ;;  %v1218_v62 = vpack.c.bf16 (!%p175_p2), %v1369_v14, %v1365_v12 }
   0xc   : > { %1227 = vmatprep.subr.bf16.mxu0 (!%p175_p2), %v1367_v13  ;;  %1203 = vmatprep.subr.bf16.mxu1 (!%p175_p2), %v1367_v13  ;;  %v1230_v21 = vpack.c.bf16 (!%p175_p2), %v396_v16, %v389_v15  ;;  %v390_v22 = vsub.f32 (!%p175_p2), %v1361_v10, %v389_v15  ;;  %v397_v23 = vsub.f32 (!%p175_p2), %v1363_v11, %v396_v16 }
   0xd   : > { %s1453_s23 = smov (!%p206_p3, %s1053_s23), 11  ;;  %v404_v36 = vsub.f32 %v1365_v12, %v403_v17  ;;  %v411_v37 = vsub.f32 %v1369_v14, %v410_v18  ;;  %v1234_v48 = vpack.c.bf16 %v410_v18, %v403_v17  ;;  %v1059_v14 = vld [vmem:[%s1450_s3] ss:$0 sm:$0xff] }
   0xe   : > { %s1373_s26 = sshll.u32 %s1453_s23, 3  ;;  %v391_v32 = vand.u32 4294901760, %v390_v22  ;;  %v398_v33 = vand.u32 4294901760, %v397_v23  ;;  %v1313_v23 = vmov 1.0  }
   0xf   : > { %s209_s29 = scalar_lea.vmem %s1447_s0, %s1373_s26  ;;  %s1389_s6 = scalar_lea.vmem %s1448_s1, %s1373_s26  ;;  %1229 = vmatpush3.bf16.msra.mxu0 %v1367_v13  ;;  %1205 = vmatpush3.bf16.msra.mxu1 %v1367_v13  ;;  %v405_v49 = vand.u32 4294901760, %v404_v36  ;;  %v412_v50 = vand.u32 4294901760, %v411_v37 }
  0x10   : > { %v223_v19 = vld [vmem:[%s209_s29] sm:$0xff]  ;;  %v224_v20 = vld [vmem:[%s209_s29 + $0x8] sm:$0xff]  ;;  %v225_v24 = vld [vmem:[%s209_s29 + $0x10] sm:$0xff]  ;;  %1231 = vmatprep.subr.bf16.mxu0 %v1230_v21  ;;  %v1206_v41 = vpack.c.bf16 %v398_v33, %v391_v32  ;;  %s221_s11 = scalar_lea.vmem %s1451_s4, %s1373_s26 }
  0x11   : > { %v266_v25 = vsel %vm264_vm0, %v223_v19, 0  ;;  %v269_v26 = vsel %vm264_vm0, %v224_v20, 0  ;;  %v272_v27 = vsel %vm264_vm0, %v225_v24, 0  ;;  %v226_v28 = vld [vmem:[%s209_s29 + $0x18] sm:$0xff]  ;;  %v228_v29 = vld [vmem:[%s1389_s6 + $0x8] sm:$0xff]  ;;  %v229_v38 = vld [vmem:[%s1389_s6 + $0x10] sm:$0xff]  ;;  %v1210_v59 = vpack.c.bf16 %v412_v50, %v405_v49 }
  0x12   : > { %v1399_v30 = vand.u32 4294901760, %v266_v25  ;;  %v1401_v31 = vand.u32 4294901760, %v269_v26  ;;  %240 = vperm.xlu1 %1278, %v228_v29   ;;  %v1405_v34 = vand.u32 4294901760, %v272_v27  ;;  %v275_v35 = vsel %vm264_vm0, %v226_v28, 0  ;;  %1207 = vmatprep.subr.bf16.mxu1 %v1206_v41  ;;  %v230_v11 = vld [vmem:[%s1389_s6 + $0x18] sm:$0xff]  ;;  %v227_v12 = vld [vmem:[%s1389_s6] sm:$0xff] }
  0x13   : > { %v376_v42 = vand.u32 4294901760, %v275_v35  ;;  %v1312_v19 = vmov 0.0  }
  0x14   : > { %v347_v39 = vsub.f32 %v266_v25, %v1399_v30  ;;  %v357_v40 = vsub.f32 %v269_v26, %v1401_v31  ;;  %v367_v43 = vsub.f32 %v272_v27, %v1405_v34 }
  0x15   : > { %v377_v46 = vsub.f32 %v275_v35, %v376_v42 }
  0x16   : > { %v348_v44 = vand.u32 4294901760, %v347_v39  ;;  %v358_v45 = vand.u32 4294901760, %v357_v40  ;;  %243 = vperm.xlu1 %1278, %v229_v38   ;;  %v368_v47 = vand.u32 4294901760, %v367_v43 }
  0x17   : > { %v378_v53 = vand.u32 4294901760, %v377_v46 }
  0x18   : > { %1164 = vmatprep.mubr.f32.mxu0 %v348_v44  ;;  %v349_v51 = vsub.f32 %v347_v39, %v348_v44  ;;  %v359_v52 = vsub.f32 %v357_v40, %v358_v45  ;;  %v369_v54 = vsub.f32 %v367_v43, %v368_v47 }
  0x19   : > { %1165 = vmatmul.mubr.f32.vlgmr.msra.gmra.mrb[0].mxu0 %v358_v45  ;;  %v379_v57 = vsub.f32 %v377_v46, %v378_v53 }
  0x1a   : > { %1233 = vmatpush3.bf16.msra.mxu0 %v1230_v21  ;;  %v350_v55 = vand.u32 4294901760, %v349_v51  ;;  %1167 = vmatprep.mubr.f32.mxu0 %v368_v47  ;;  %v360_v56 = vand.u32 4294901760, %v359_v52  ;;  %v370_v58 = vand.u32 4294901760, %v369_v54 }
  0x1b   : > { %1235 = vmatprep.subr.bf16.mxu0 %v1234_v48  ;;  %v380_v60 = vand.u32 4294901760, %v379_v57 }
  0x1c   : > { %1122 = vmatprep.mubr.f32.mxu1 %v350_v55 }
  0x1d   : > { %1123 = vmatmul.mubr.f32.vlgmr.msra.gmra.mrb[0].mxu1 %v360_v56  ;;  %1168 = vmatmul.mubr.f32.gmra.mrb[2].mxu0 %v378_v53 }
  0x1e   : > { %1209 = vmatpush3.bf16.msra.mxu1 %v1206_v41  ;;  %1237 = vmatpush3.bf16.msra.mxu0 %v1234_v48 }
  0x1f   : > { %1125 = vmatprep.mubr.f32.mxu1 %v370_v58  ;;  %1211 = vmatprep.subr.bf16.mxu1 %v1210_v59 }
  0x20   : > { %1178 = vmatprep.mubr.f32.mxu0 %v1399_v30  ;;  %1239 = vmatprep.subr.bf16.mxu0 %v1359_v9 }
  0x21   : > { %1126 = vmatmul.mubr.f32.gmra.mrb[2].mxu1 %v380_v60  ;;  %1179 = vmatmul.mubr.f32.vlgmr.msra.gmra.mrb[0].mxu0 %v1401_v31 }
  0x22   : > { %1213 = vmatpush3.bf16.msra.mxu1 %v1210_v59  ;;  %1241 = vmatpush3.bf16.msra.mxu0 %v1359_v9 }
  0x23   : > { %1136 = vmatprep.mubr.f32.mxu1 %v1399_v30  ;;  %1215 = vmatprep.subr.bf16.mxu1 %v1214_v61 }
  0x24   : > { %1181 = vmatprep.mubr.f32.mxu0 %v1405_v34  ;;  %1243 = vmatprep.subr.bf16.mxu0 %v1367_v13 }
  0x25   : > { %1137 = vmatmul.mubr.f32.vlgmr.msra.gmra.mrb[0].mxu1 %v1401_v31  ;;  %1182 = vmatmul.mubr.f32.gmra.mrb[2].mxu0 %v376_v42 }
  0x26   : > { %1217 = vmatpush3.bf16.msra.mxu1 %v1214_v61  ;;  %1245 = vmatpush3.bf16.msra.mxu0 %v1367_v13 }
  0x27   : > { %1139 = vmatprep.mubr.f32.mxu1 %v1405_v34  ;;  %1219 = vmatprep.subr.bf16.mxu1 %v1218_v62 }
  0x28   : > { %1192 = vmatprep.mubr.f32.mxu0 %v1399_v30 }
  0x29   : > { %1140 = vmatmul.mubr.f32.gmra.mrb[2].mxu1 %v376_v42  ;;  %1193 = vmatmul.mubr.f32.vlgmr.msra.gmra.mrb[0].mxu0 %v1401_v31 }
  0x2a   : > { %1221 = vmatpush3.bf16.msra.mxu1 %v1218_v62  ;;  %1150 = vmatprep.mubr.f32.mxu1 %v347_v39 }
  0x2b   : > { %1195 = vmatprep.mubr.f32.mxu0 %v1405_v34 }
  0x2d   : > { %1151 = vmatmul.mubr.f32.vlgmr.msra.gmra.mrb[0].mxu1 %v357_v40  ;;  %1196 = vmatmul.mubr.f32.gmra.mrb[2].mxu0 %v376_v42 }
  0x2e   : > { %1153 = vmatprep.mubr.f32.mxu1 %v367_v43 }
  0x31   : > { %1154 = vmatmul.mubr.f32.gmra.mrb[2].mxu1 %v377_v46 }
  0x91   : > { %v241_v13 = vpop.permute.xlu1 %240 }
  0x92   : > { %vm253_vm1 = vcmp.eq.s32.totalorder %v241_v13, %v1059_v14 }
  0x93   : > { %v1061_v20 = vsel %vm253_vm1, 1.0, %v1312_v19 }
  0x95   : > { %v244_v15 = vpop.permute.xlu1 %243 }
  0x96   : > { %vm254_vm6 = vcmp.eq.s32.totalorder %v244_v15, %v1059_v14 }
  0x97   : > { %v1062_v41 = vsel %vm254_vm6, 1.0, %v1312_v19 }
  0xfc   : > { %v1194_v63 = vpop.f32.mrb[0].mxu0 }
  0xfd   : > { %v869_v0 = vpop.f32.mrb[1].mxu0 }
 0x100   : > { %v1152_v1 = vpop.f32.mrb[0].mxu1  ;;  %v1197_v2 = vpop.f32.mrb[2].mxu0 }
 0x101   : > { %v1246_v3 = vadd.f32 %v1194_v63, %v1152_v1  ;;  %v571_v4 = vpop.f32.mrb[1].mxu1  ;;  %v881_v5 = vpop.f32.mrb[3].mxu0 }
 0x102   : > { %v1247_v6 = vadd.f32 %v869_v0, %v571_v4 }
 0x103   : > { %893 = vmax.xlane.f32.xlu0 %v1246_v3 }
 0x104   : > { %v1155_v7 = vpop.f32.mrb[2].mxu1 }
 0x105   : > { %v1248_v8 = vadd.f32 %v1197_v2, %v1155_v7  ;;  %v585_v9 = vpop.f32.mrb[3].mxu1 }
 0x106   : > { %v1249_v10 = vadd.f32 %v881_v5, %v585_v9 }
 0x107   : > { %891 = vmax.xlane.f32.xlu0 %v1247_v6  ;;  %897 = vmax.xlane.f32.xlu1 %v1248_v8 }
 0x10b   : > { %895 = vmax.xlane.f32.xlu1 %v1249_v10 }
 0x11c   : > { %246 = vperm.xlu1 %1278, %v230_v11  }
 0x11d   : > { %237 = vperm.xlu0 %1277, %v227_v12  }
 0x190   : > { %v894_v16 = vpop.xlane.xlu0 %893 }
 0x191   : > { %v900_v17 = vsub.f32 %v1246_v3, %v894_v16 }
 0x193   : > { %v917_v18 = vmul.f32 1.442695, %v900_v17  ;;  %vm904_vm2 = vcmp.eq.f32.partialorder %v900_v17, 0.0 }
 0x194   : > { %v892_v21 = vpop.xlane.xlu0 %891  ;;  %v898_v22 = vpop.xlane.xlu1 %897  ;;  %v908_v24 = vsel %vm904_vm2, 0.0, %v1313_v23 }
 0x195   : > { %1279 = vpow2.f32 %v917_v18  ;;  %v899_v25 = vsub.f32 %v1247_v6, %v892_v21  ;;  %v902_v26 = vsub.f32 %v1248_v8, %v898_v22  ;;  %v912_v27 = vmul.f32 %v1061_v20, %v908_v24 }
 0x197   : > { %v915_v28 = vmul.f32 1.442695, %v899_v25  ;;  %v921_v29 = vmul.f32 1.442695, %v902_v26  ;;  %945 = vadd.xlane.f32.xlu1 %v912_v27  ;;  %vm903_vm3 = vcmp.eq.f32.partialorder %v899_v25, 0.0  ;;  %vm906_vm7 = vcmp.eq.f32.partialorder %v902_v26, 0.0 }
 0x198   : > { %v896_v30 = vpop.xlane.xlu1 %895  ;;  %v907_v35 = vsel %vm903_vm3, 0.0, %v1313_v23  ;;  %v910_v46 = vsel %vm906_vm7, 0.0, %v1313_v23  ;;  %v952_v54 = vmul.f32 %v912_v27, %v900_v17 }
 0x199   : > { %1281 = vpow2.f32 %v915_v28  ;;  %v901_v31 = vsub.f32 %v1249_v10, %v896_v30 }
 0x19a   : > { %1283 = vpow2.f32 %v921_v29 }
 0x19b   : > { %v919_v32 = vmul.f32 1.442695, %v901_v31  ;;  %vm905_vm5 = vcmp.eq.f32.partialorder %v901_v31, 0.0 }
 0x19c   : > { %v238_v33 = vpop.permute.xlu0 %237  ;;  %v909_v39 = vsel %vm905_vm5, 0.0, %v1313_v23  ;;  %v247_v45 = vpop.permute.xlu1 %246 }
 0x19d   : > { %vm252_vm4 = vcmp.eq.s32.totalorder %v238_v33, %v1059_v14  ;;  %1285 = vpow2.f32 %v919_v32  ;;  %v913_v43 = vmul.f32 %v1062_v41, %v909_v39  ;;  %vm255_vm8 = vcmp.eq.s32.totalorder %v247_v45, %v1059_v14 }
 0x19e   : > { %v1060_v34 = vsel %vm252_vm4, 1.0, %v1312_v19  ;;  %v1063_v52 = vsel %vm255_vm8, 1.0, %v1312_v19 }
 0x19f   : > { %v1280_v36 = vpop.eup %1279  ;;  %v911_v37 = vmul.f32 %v1060_v34, %v907_v35  ;;  %v953_v51 = vmul.f32 %v913_v43, %v901_v31  ;;  %v914_v53 = vmul.f32 %v1063_v52, %v910_v46 }
 0x1a0   : > { %v924_v38 = vmul.f32 %v1280_v36, %v908_v24 }
 0x1a1   : > { %943 = vadd.xlane.f32.xlu1 %v911_v37  ;;  %v951_v48 = vmul.f32 %v911_v37, %v899_v25  ;;  %v954_v55 = vmul.f32 %v914_v53, %v902_v26 }
 0x1a2   : > { %929 = vadd.xlane.f32.xlu0 %v924_v38 }
 0x1a3   : > { %v1282_v40 = vpop.eup %1281 }
 0x1a4   : > { %v923_v42 = vmul.f32 %v1282_v40, %v907_v35  ;;  %v1284_v44 = vpop.eup %1283 }
 0x1a5   : > { %v926_v47 = vmul.f32 %v1284_v44, %v910_v46 }
 0x1a6   : > { %927 = vadd.xlane.f32.xlu1 %v923_v42  ;;  %947 = vadd.xlane.f32.xlu0 %v913_v43 }
 0x1a7   : > { %v1286_v49 = vpop.eup %1285 }
 0x1a8   : > { %v925_v50 = vmul.f32 %v1286_v49, %v909_v39 }
 0x1aa   : > { %933 = vadd.xlane.f32.xlu1 %v926_v47  ;;  %955 = vadd.xlane.f32.xlu0 %v951_v48 }
 0x1ae   : > { %931 = vadd.xlane.f32.xlu1 %v925_v50  ;;  %959 = vadd.xlane.f32.xlu0 %v953_v51 }
 0x1b2   : > { %949 = vadd.xlane.f32.xlu1 %v914_v53 }
 0x1b6   : > { %957 = vadd.xlane.f32.xlu1 %v952_v54 }
 0x1ba   : > { %961 = vadd.xlane.f32.xlu1 %v954_v55 }
 0x224   : > { %v946_v56 = vpop.xlane.xlu1 %945 }
 0x22e   : > { %v944_v57 = vpop.xlane.xlu1 %943 }
 0x22f   : > { %v930_v58 = vpop.xlane.xlu0 %929  ;;  %1287 = vrcp.f32 %v944_v57 }
 0x233   : > { %v928_v59 = vpop.xlane.xlu1 %927  ;;  %v948_v60 = vpop.xlane.xlu0 %947 }
 0x234   : > { %1289 = vlog2.f32 %v928_v59 }
 0x235   : > { %1291 = vlog2.f32 %v930_v58 }
 0x236   : > { %1293 = vrcp.f32 %v946_v56 }
 0x237   : > { %v934_v61 = vpop.xlane.xlu1 %933  ;;  %1295 = vrcp.f32 %v948_v60  ;;  %v956_v1 = vpop.xlane.xlu0 %955 }
 0x239   : > { %v1288_v63 = vpop.eup %1287 }
 0x23a   : > { %v964_v4 = vmul.f32 %v1288_v63, %v956_v1 }
 0x23b   : > { %v932_v62 = vpop.xlane.xlu1 %931  ;;  %v960_v13 = vpop.xlane.xlu0 %959 }
 0x23c   : > { %1297 = vlog2.f32 %v932_v62 }
 0x23d   : > { %1299 = vlog2.f32 %v934_v61 }
 0x23e   : > { %v1290_v0 = vpop.eup %1289 }
 0x23f   : > { %v950_v2 = vpop.xlane.xlu1 %949  ;;  %v936_v3 = vmul.f32 0.6931472, %v1290_v0  ;;  %v1292_v5 = vpop.eup %1291 }
 0x240   : > { %1301 = vrcp.f32 %v950_v2  ;;  %v1294_v7 = vpop.eup %1293  ;;  %v938_v10 = vmul.f32 0.6931472, %v1292_v5 }
 0x241   : > { %v971_v6 = vsub.f32 %v964_v4, %v936_v3  ;;  %v1296_v9 = vpop.eup %1295 }
 0x242   : > { %v968_v15 = vmul.f32 %v1296_v9, %v960_v13 }
 0x243   : > { %v958_v8 = vpop.xlane.xlu1 %957  ;;  %976 = vst.msk [vmem:[%s221_s11] sm:$0xff] %vm975_vm9, %v971_v6 }
 0x244   : > { %v966_v11 = vmul.f32 %v1294_v7, %v958_v8 }
 0x246   : > { %v1298_v12 = vpop.eup %1297  ;;  %v972_v14 = vsub.f32 %v966_v11, %v938_v10 }
 0x247   : > { %v940_v16 = vmul.f32 0.6931472, %v1298_v12  ;;  %v1300_v17 = vpop.eup %1299  ;;  %v962_v20 = vpop.xlane.xlu1 %961 }
 0x248   : > { %977 = vst.msk [vmem:[%s221_s11 + $0x8] sm:$0xff] %vm975_vm9, %v972_v14  ;;  %v942_v21 = vmul.f32 0.6931472, %v1300_v17 }
 0x249   : > { %v973_v18 = vsub.f32 %v968_v15, %v940_v16 }
 0x24a   : > { %v1302_v19 = vpop.eup %1301 }
 0x24b   : > { %978 = vst.msk [vmem:[%s221_s11 + $0x10] sm:$0xff] %vm975_vm9, %v973_v18  ;;  %v970_v22 = vmul.f32 %v1302_v19, %v962_v20 }
 0x24d   : > { %v974_v23 = vsub.f32 %v970_v22, %v942_v21 }
 0x24f   : > { %979 = vst.msk [vmem:[%s221_s11 + $0x18] sm:$0xff] %vm975_vm9, %v974_v23 }
 0x250 PF: > { %s14_s15 = sadd.s32 1, %s1309_s15  }
 0x251   : > { %p11_p4 = scmp.ge.s32.totalorder %s14_s15, 5  }
 0x253   :  { %13 = sbr.rel (!%p11_p4) target bundleno = 1 (0x1), region = 69 }

</bundles_post_ra>
